<compile_context>
chip_gen: v5e
topology: v5e:2x2
jax: 0.10.0
libtpu: 0.0.40
codegen_flags: <defaults>
</compile_context>

<pallas_src>
import functools

import jax
import jax.numpy as jnp
from jax.experimental import pallas as pl
from jax.experimental.pallas import tpu as pltpu


def _fused_gcn_kernel(adj_ref, xw1_ref, b1_ref, w2_ref, b2_ref, out_ref,
                      hw2_ref, *, row_tile, adj_resident):
    """phase 0: HW2[tile] = relu(A[tile] @ XW1 + b1) @ W2   (VMEM scratch only)
       phase 1: out[tile] = log_softmax(A[tile] @ HW2 + b2)"""
    phase = pl.program_id(0)     # 0: layer 1 (+ folded H@W2), 1: layer 2
    tile = pl.program_id(1)      # row tile of A_hat / output
    row0 = pl.multiple_of(tile * row_tile, row_tile)

    if adj_resident:
        adj_tile = adj_ref[pl.ds(row0, row_tile), :]   # slice resident (N, N)
    else:
        adj_tile = adj_ref[...]                        # streamed (row_tile, N)

    # ---- phase 0: layer-1 row tile; H never leaves vregs, only HW2 is kept.
    @pl.when(phase == 0)
    def _():
        h = jnp.dot(adj_tile, xw1_ref[...], preferred_element_type=jnp.float32)
        h = jnp.maximum(h + b1_ref[...], 0.0)          # bias + ReLU in f32 (VPU)
        # dropout(training=False) == identity
        hw2 = jnp.dot(h.astype(jnp.bfloat16), w2_ref[...],
                      preferred_element_type=jnp.float32)
        hw2_ref[pl.ds(row0, row_tile), :] = hw2.astype(jnp.bfloat16)

    # ---- phase 1: layer-2 row tile + fused log_softmax over the class axis.
    # (No output write in phase 0: out block 0 is only flushed after phase-1
    #  tile 0 has fully overwritten it -- see out_specs index_map.)
    @pl.when(phase == 1)
    def _():
        z = jnp.dot(adj_tile, hw2_ref[...], preferred_element_type=jnp.float32)
        z = z + b2_ref[...]
        m = jnp.max(z, axis=1, keepdims=True)
        lse = jnp.log(jnp.sum(jnp.exp(z - m), axis=1, keepdims=True))
        out_ref[...] = z - m - lse


def _resident_spec(block_shape):
    """Constant-index resident input; single-buffered when Buffered exists."""
    index_map = lambda p, i: (0,) * len(block_shape)
    if hasattr(pl, "Buffered"):
        try:
            return pl.BlockSpec(block_shape, index_map,
                                pipeline_mode=pl.Buffered(1))
        except TypeError:  # older jax: no pipeline_mode kwarg
            pass
    return pl.BlockSpec(block_shape, index_map)


def _vmem_tile_bytes(rows, cols, itemsize):
    """Conservative VMEM footprint of one (rows, cols) buffer (8x128 padding)."""
    pad = lambda v, m: -(-v // m) * m
    return pad(rows, 8) * pad(cols, 128) * itemsize


def gcn_forward(adj_hat, x, w1, b1, w2, b2, *, row_tile=None, adj_resident=None):
    n, f_in = x.shape
    hidden = w1.shape[1]
    n_classes = w2.shape[1]

    # ---- X @ W1 outside the kernel (plain XLA, f32 accumulate); bf16 at the
    # ---- HBM boundary.  Kernel residents shrink from N*f_in to N*hidden.
    xw1 = jnp.dot(x.astype(jnp.float32), w1.astype(jnp.float32),
                  preferred_element_type=jnp.float32).astype(jnp.bfloat16)
    adj_bf = adj_hat.astype(jnp.bfloat16)
    w2_bf = w2.astype(jnp.bfloat16)
    b1_2d = b1.reshape(1, hidden).astype(jnp.float32)
    b2_2d = b2.reshape(1, n_classes).astype(jnp.float32)

    # ---- per-chip VMEM budget (v5e/v6e: 128 MiB, v7x: 64 MiB physical).
    try:
        phys_vmem = int(pltpu.get_tpu_info().vmem_capacity_bytes)
    except Exception:
        phys_vmem = 64 * 1024 * 1024
    vmem_budget = (phys_vmem * 3) // 4        # headroom for compiler scratch

    # ---- row tile: biggest that divides N (fewer grid steps, bigger DMA).
    if row_tile is None:
        if n <= 512:
            row_tile = n
        else:
            row_tile = next((c for c in (512, 256, 128, 64, 32, 16)
                             if n % c == 0), n)
    assert n % row_tile == 0, "row_tile must divide N"
    assert row_tile == n or row_tile % 16 == 0, \
        "row_tile must be sublane-aligned (bf16)"

    # ---- VMEM accounting (residents counted double-buffered unless
    # ---- Buffered(1) is available).
    res_bufs = 1 if hasattr(pl, "Buffered") else 2
    resident_fixed = (
        res_bufs * _vmem_tile_bytes(n, hidden, 2)             # X @ W1
        + res_bufs * _vmem_tile_bytes(hidden, n_classes, 2)   # W2
        + res_bufs * (_vmem_tile_bytes(1, hidden, 4)
                      + _vmem_tile_bytes(1, n_classes, 4))    # biases
        + _vmem_tile_bytes(n, n_classes, 2))                  # HW2 scratch
    out_bytes = 2 * _vmem_tile_bytes(row_tile, n_classes, 4)

    if adj_resident is None:
        adj_resident = (resident_fixed + out_bytes
                        + res_bufs * _vmem_tile_bytes(n, n, 2)) <= vmem_budget
    if not adj_resident:
        # Shrink the streamed A tile until the double-buffered stream fits.
        while (resident_fixed + out_bytes
               + 2 * _vmem_tile_bytes(row_tile, n, 2) > vmem_budget
               and row_tile > 16 and row_tile % 32 == 0):
            row_tile //= 2
            out_bytes = 2 * _vmem_tile_bytes(row_tile, n_classes, 4)
        # TODO(synk): K axis over A_hat columns instead of shrinking further.
    n_tiles = n // row_tile

    if adj_resident:
        adj_spec = _resident_spec((n, n))                    # fetched once
    else:
        adj_spec = pl.BlockSpec((row_tile, n), lambda p, i: (i, 0))

    flops = (2 * n * n * hidden               # A @ (X W1)
             + 2 * n * hidden * n_classes     # H @ W2
             + 2 * n * n * n_classes)         # A @ (H W2)
    adj_passes = 1 if adj_resident else 2
    bytes_accessed = (adj_passes * n * n * 2
                      + n * hidden * 2
                      + hidden * n_classes * 2
                      + (hidden + n_classes) * 4
                      + n * n_classes * 4)
    cost = pl.CostEstimate(flops=flops,
                           transcendentals=n * (n_classes + 1),
                           bytes_accessed=bytes_accessed)

    grid_spec = pltpu.PrefetchScalarGridSpec(
        num_scalar_prefetch=0,
        grid=(2, n_tiles),                                   # (phase, row tile)
        in_specs=[
            adj_spec,                                        # A_hat
            _resident_spec((n, hidden)),                     # X @ W1
            _resident_spec((1, hidden)),                     # b1
            _resident_spec((hidden, n_classes)),             # W2
            _resident_spec((1, n_classes)),                  # b2
        ],
        # Phase 0 writes nothing; aliasing all its iterations onto block 0
        # means the only HBM output writebacks are the n_tiles phase-1 blocks.
        out_specs=pl.BlockSpec((row_tile, n_classes), lambda p, i: (i * p, 0)),
        scratch_shapes=[
            pltpu.VMEM((n, n_classes), jnp.bfloat16),        # HW2 = relu(.)@W2
        ],
    )

    kernel = functools.partial(_fused_gcn_kernel,
                               row_tile=row_tile, adj_resident=adj_resident)

    return pl.pallas_call(
        kernel,
        out_shape=jax.ShapeDtypeStruct((n, n_classes), jnp.float32),
        grid_spec=grid_spec,
        compiler_params=pltpu.CompilerParams(
            # Phase 1 reads the full HW2 scratch built by phase 0, and HW2
            # lives in per-core VMEM, so neither axis may be megacore-sharded
            # in this fused single-call form (see v7x TODO above).
            dimension_semantics=("arbitrary", "arbitrary"),
            vmem_limit_bytes=int(vmem_budget),
        ),
        cost_estimate=cost,
    )(adj_bf, xw1, b1_2d, w2_bf, b2_2d)


def build_normalized_adjacency(edge_index, num_nodes):
    """Dense A_hat = D^{-1/2} (A + I) D^{-1/2} matching PyG GCNConv semantics.

    A[dst, src] counts edges src->dst (messages flow source->target; duplicate
    edges accumulate like GCNConv's add-aggregation).  Self-loops are only
    added to nodes that do not already have one; D is the row sum.
    """
    src, dst = edge_index[0], edge_index[1]
    adj = jnp.zeros((num_nodes, num_nodes), jnp.float32)
    adj = adj.at[dst, src].add(1.0)
    diag = jnp.diagonal(adj)
    adj = adj + jnp.diag(jnp.where(diag > 0.0, 0.0, 1.0))
    deg = jnp.sum(adj, axis=1)
    d_inv_sqrt = jnp.where(deg > 0.0, 1.0 / jnp.sqrt(deg), 0.0)
    return d_inv_sqrt[:, None] * adj * d_inv_sqrt[None, :]


if __name__ == "__main__":
    # Small deterministic problem: 64 nodes, 16 node features, 16 hidden, 8 classes.
    N, F_IN, HIDDEN, NUM_CLASSES, E = 64, 16, 16, 8, 256

    key = jax.random.PRNGKey(0)
    k_src, k_dst, k_x, k_w1, k_w2 = jax.random.split(key, 5)

    # Graph (edge_index) and node features, as in torch_geometric `data`.
    src = jax.random.randint(k_src, (E,), 0, N)
    dst = jax.random.randint(k_dst, (E,), 0, N)
    edge_index = jnp.stack([src, dst], axis=0)           # [2, E]
    x = jax.random.normal(k_x, (N, F_IN), jnp.float32)   # [N, F_in]

    # Deterministic parameter init (glorot-ish scale), biases zero as in GCNConv.
    w1 = jax.random.normal(k_w1, (F_IN, HIDDEN), jnp.float32) * (1.0 / jnp.sqrt(F_IN))
    b1 = jnp.zeros((HIDDEN,), jnp.float32)
    w2 = jax.random.normal(k_w2, (HIDDEN, NUM_CLASSES), jnp.float32) * (1.0 / jnp.sqrt(HIDDEN))
    b2 = jnp.zeros((NUM_CLASSES,), jnp.float32)

    adj_hat = build_normalized_adjacency(edge_index, N)

    # Pure-JAX f32 reference for numerical check.
    def ref_forward(adj, xx, a1, c1, a2, c2):
        h = jnp.maximum(adj @ (xx @ a1) + c1, 0.0)
        z = adj @ (h @ a2) + c2
        return jax.nn.log_softmax(z, axis=1)

    expected = ref_forward(adj_hat, x, w1, b1, w2, b2)

    def check(out):
        out = jax.block_until_ready(out)
        assert out.shape == (N, NUM_CLASSES)
        row_sums = jnp.sum(jnp.exp(out), axis=1)
        assert bool(jnp.all(jnp.abs(row_sums - 1.0) < 1e-3))
        assert bool(jnp.max(jnp.abs(out - expected)) < 3e-2)   # bf16-operand tolerance

    # Resident-A path, multi-tile grid (2 phases x 2 row tiles).
    check(gcn_forward(adj_hat, x, w1, b1, w2, b2, row_tile=32, adj_resident=True))
    # Streamed-A fallback path (same grid).
    check(gcn_forward(adj_hat, x, w1, b1, w2, b2, row_tile=32, adj_resident=False))
    # Auto configuration (single row tile, resident A).
    check(gcn_forward(adj_hat, x, w1, b1, w2, b2))

    print("KERNEL_OK")
</pallas_src>

<mosaic_0001>
module attributes {stable_mosaic.version = 11 : i64} {
  func.func @_fused_gcn_kernel(%arg0: i32, %arg1: i32, %arg2: memref<64x64xbf16, #tpu.memory_space<vmem>>, %arg3: memref<64x16xbf16, #tpu.memory_space<vmem>>, %arg4: memref<1x16xf32, #tpu.memory_space<vmem>>, %arg5: memref<16x8xbf16, #tpu.memory_space<vmem>>, %arg6: memref<1x8xf32, #tpu.memory_space<vmem>>, %arg7: memref<32x8xf32, #tpu.memory_space<vmem>>, %arg8: memref<64x8xbf16, #tpu.memory_space<vmem>>) attributes {dimension_semantics = [#tpu.dimension_semantics<arbitrary>, #tpu.dimension_semantics<arbitrary>], iteration_bounds = array<i64: 2, 2>, scalar_prefetch = 0 : i64, scratch_operands = 1 : i64, tpu.core_type = #tpu.core_type<tc>, window_params = [{pipeline_mode = #tpu.pipeline_mode<synchronous>, transform_indices = @transform_0, window_bounds = array<i64: 64, 64>}, {pipeline_mode = #tpu.pipeline_mode<synchronous>, transform_indices = @transform_1, window_bounds = array<i64: 64, 16>}, {pipeline_mode = #tpu.pipeline_mode<synchronous>, transform_indices = @transform_2, window_bounds = array<i64: 1, 16>}, {pipeline_mode = #tpu.pipeline_mode<synchronous>, transform_indices = @transform_3, window_bounds = array<i64: 16, 8>}, {pipeline_mode = #tpu.pipeline_mode<synchronous>, transform_indices = @transform_4, window_bounds = array<i64: 1, 8>}, {transform_indices = @transform_5, window_bounds = array<i64: 32, 8>}]} {
    %c32_i32 = arith.constant 32 : i32
    %0 = arith.muli %arg1, %c32_i32 : i32
    %1 = tpu.assume_multiple %0, 32 : i32
    %2 = arith.index_cast %1 : i32 to index
    %c0 = arith.constant 0 : index
    %3 = vector.load %arg2[%2, %c0] : memref<64x64xbf16, #tpu.memory_space<vmem>>, vector<32x64xbf16>
    %c0_i32 = arith.constant 0 : i32
    %4 = arith.cmpi eq, %arg0, %c0_i32 : i32
    %5 = arith.extui %4 : i1 to i32
    %c0_i32_0 = arith.constant 0 : i32
    %6 = arith.cmpi ne, %5, %c0_i32_0 : i32
    scf.if %6 {
      %c0_2 = arith.constant 0 : index
      %c0_3 = arith.constant 0 : index
      %10 = vector.load %arg3[%c0_2, %c0_3] : memref<64x16xbf16, #tpu.memory_space<vmem>>, vector<64x16xbf16>
      %cst = arith.constant dense<0.000000e+00> : vector<32x16xf32>
      %11 = tpu.matmul %3, %10, %cst {dimension_numbers = #tpu.dot_dimension_numbers<[1], [0], [0], [1], [0, 0, 1, 1], [], []>} : vector<32x64xbf16>, vector<64x16xbf16>, vector<32x16xf32> -> vector<32x16xf32>
      %c0_4 = arith.constant 0 : index
      %c0_5 = arith.constant 0 : index
      %12 = vector.load %arg4[%c0_4, %c0_5] : memref<1x16xf32, #tpu.memory_space<vmem>>, vector<1x16xf32>
      %13 = vector.broadcast %12 : vector<1x16xf32> to vector<32x16xf32>
      %14 = arith.addf %11, %13 : vector<32x16xf32>
      %cst_6 = arith.constant 0.000000e+00 : f32
      %15 = vector.broadcast %cst_6 : f32 to vector<32x16xf32>
      %16 = arith.maximumf %14, %15 : vector<32x16xf32>
      %17 = arith.truncf %16 : vector<32x16xf32> to vector<32x16xbf16>
      %c0_7 = arith.constant 0 : index
      %c0_8 = arith.constant 0 : index
      %18 = vector.load %arg5[%c0_7, %c0_8] : memref<16x8xbf16, #tpu.memory_space<vmem>>, vector<16x8xbf16>
      %cst_9 = arith.constant dense<0.000000e+00> : vector<32x8xf32>
      %19 = tpu.matmul %17, %18, %cst_9 {dimension_numbers = #tpu.dot_dimension_numbers<[1], [0], [0], [1], [0, 0, 1, 1], [], []>} : vector<32x16xbf16>, vector<16x8xbf16>, vector<32x8xf32> -> vector<32x8xf32>
      %20 = arith.truncf %19 : vector<32x8xf32> to vector<32x8xbf16>
      %21 = arith.index_cast %1 : i32 to index
      %c0_10 = arith.constant 0 : index
      %22 = vector.load %arg8[%21, %c0_10] : memref<64x8xbf16, #tpu.memory_space<vmem>>, vector<32x8xbf16>
      tpu.vector_store %arg8[%21, %c0_10], %20 {strides = array<i32>} : memref<64x8xbf16, #tpu.memory_space<vmem>>, vector<32x8xbf16>,
    } else {
    }
    %c1_i32 = arith.constant 1 : i32
    %7 = arith.cmpi eq, %arg0, %c1_i32 : i32
    %8 = arith.extui %7 : i1 to i32
    %c0_i32_1 = arith.constant 0 : i32
    %9 = arith.cmpi ne, %8, %c0_i32_1 : i32
    scf.if %9 {
      %c0_2 = arith.constant 0 : index
      %c0_3 = arith.constant 0 : index
      %10 = vector.load %arg8[%c0_2, %c0_3] : memref<64x8xbf16, #tpu.memory_space<vmem>>, vector<64x8xbf16>
      %cst = arith.constant dense<0.000000e+00> : vector<32x8xf32>
      %11 = tpu.matmul %3, %10, %cst {dimension_numbers = #tpu.dot_dimension_numbers<[1], [0], [0], [1], [0, 0, 1, 1], [], []>} : vector<32x64xbf16>, vector<64x8xbf16>, vector<32x8xf32> -> vector<32x8xf32>
      %c0_4 = arith.constant 0 : index
      %c0_5 = arith.constant 0 : index
      %12 = vector.load %arg6[%c0_4, %c0_5] : memref<1x8xf32, #tpu.memory_space<vmem>>, vector<1x8xf32>
      %13 = vector.broadcast %12 : vector<1x8xf32> to vector<32x8xf32>
      %14 = arith.addf %11, %13 : vector<32x8xf32>
      %cst_6 = arith.constant dense<0xFF800000> : vector<32xf32>
      %15 = vector.multi_reduction <maximumf>, %14, %cst_6 [1] : vector<32x8xf32> to vector<32xf32>
      %16 = vector.shape_cast %15 : vector<32xf32> to vector<32x1xf32>
      %17 = vector.broadcast %16 : vector<32x1xf32> to vector<32x8xf32>
      %18 = arith.subf %14, %17 : vector<32x8xf32>
      %19 = math.exp %18 : vector<32x8xf32>
      %cst_7 = arith.constant dense<0.000000e+00> : vector<32xf32>
      %20 = vector.multi_reduction <add>, %19, %cst_7 [1] : vector<32x8xf32> to vector<32xf32>
      %21 = vector.shape_cast %20 : vector<32xf32> to vector<32x1xf32>
      %22 = math.log %21 : vector<32x1xf32>
      %23 = vector.broadcast %16 : vector<32x1xf32> to vector<32x8xf32>
      %24 = arith.subf %14, %23 : vector<32x8xf32>
      %25 = vector.broadcast %22 : vector<32x1xf32> to vector<32x8xf32>
      %26 = arith.subf %24, %25 : vector<32x8xf32>
      %c0_8 = arith.constant 0 : index
      %c0_9 = arith.constant 0 : index
      %27 = vector.load %arg7[%c0_8, %c0_9] : memref<32x8xf32, #tpu.memory_space<vmem>>, vector<32x8xf32>
      tpu.vector_store %arg7[%c0_8, %c0_9], %26 {strides = array<i32>} : memref<32x8xf32, #tpu.memory_space<vmem>>, vector<32x8xf32>,
    } else {
    }
    return
  }
  func.func @transform_0(%arg0: i32, %arg1: i32) -> (i32, i32) {
    %c0_i32 = arith.constant 0 : i32
    %c0_i32_0 = arith.constant 0 : i32
    %c0_i32_1 = arith.constant 0 : i32
    return %c0_i32, %c0_i32_0 : i32, i32
  }
  func.func @transform_1(%arg0: i32, %arg1: i32) -> (i32, i32) {
    %c0_i32 = arith.constant 0 : i32
    %c0_i32_0 = arith.constant 0 : i32
    %c0_i32_1 = arith.constant 0 : i32
    return %c0_i32, %c0_i32_0 : i32, i32
  }
  func.func @transform_2(%arg0: i32, %arg1: i32) -> (i32, i32) {
    %c0_i32 = arith.constant 0 : i32
    %c0_i32_0 = arith.constant 0 : i32
    %c0_i32_1 = arith.constant 0 : i32
    return %c0_i32, %c0_i32_0 : i32, i32
  }
  func.func @transform_3(%arg0: i32, %arg1: i32) -> (i32, i32) {
    %c0_i32 = arith.constant 0 : i32
    %c0_i32_0 = arith.constant 0 : i32
    %c0_i32_1 = arith.constant 0 : i32
    return %c0_i32, %c0_i32_0 : i32, i32
  }
  func.func @transform_4(%arg0: i32, %arg1: i32) -> (i32, i32) {
    %c0_i32 = arith.constant 0 : i32
    %c0_i32_0 = arith.constant 0 : i32
    %c0_i32_1 = arith.constant 0 : i32
    return %c0_i32, %c0_i32_0 : i32, i32
  }
  func.func @transform_5(%arg0: i32, %arg1: i32) -> (i32, i32) {
    %0 = arith.muli %arg1, %arg0 : i32
    %c0_i32 = arith.constant 0 : i32
    %c0_i32_0 = arith.constant 0 : i32
    return %0, %c0_i32 : i32, i32
  }
}

</mosaic_0001>

<bundles_post_ra>
// kernel: tpu_custom_call.1
= control target key start
LH: loop header
LB: loop body
LE: loop exit
PB: predicated region body
PF: predicated region fallthrough
CT: control target
= control target key end

     0   :  { %s773_s18 = smov 0   ;;  %s775_s19 = smov 0   ;;  %s887_s0 = inlined_call_operand.vmem [shape: bf16[64,64], index: 0, kind: input, shape index: {}]   ;;  %s888_s1 = inlined_call_operand.vmem [shape: bf16[64,16], index: 1, kind: input, shape index: {}]   ;;  %s889_s2 = inlined_call_operand.vmem [shape: f32[1,16], index: 2, kind: input, shape index: {}]   ;;  %s890_s3 = inlined_call_operand.vmem [shape: bf16[16,8], index: 3, kind: input, shape index: {}]   ;;  %s891_s4 = inlined_call_operand.vmem [shape: f32[1,8], index: 4, kind: input, shape index: {}]   ;;  %s892_s5 = inlined_call_operand.vmem [shape: f32[64,8], index: 5, kind: output, shape index: {}]  }
   0x1   :  { %s777_s20 = smov 0   ;;  %s779_s21 = smov 0  }
   0x2   :  { %s781_s22 = smov 0  }
   0x3 LB: > { %s24_s23 = sadd.s32 1, %s733_s20  ;;  %s27_s24 = sadd.s32 1, %s737_s21  ;;  %s741_s22 = sphi %s781_s22, %s15_s22   ;;  %s737_s21 = sphi %s779_s21, %s896_s21   ;;  %s733_s20 = sphi %s777_s20, %s895_s20   ;;  %s729_s19 = sphi %s775_s19, %s894_s19   ;;  %s725_s18 = sphi %s773_s18, %s893_s18  }
   0x4   : > { %p25_p0 = scmp.ge.s32.totalorder %s24_s23, 2  ;;  %p555_p1 = scmp.ge.s32.totalorder %s741_s22, 1 }
   0x5   : > { %p191_p2 = scmp.lt.s32.totalorder %s741_s22, 5 }
   0x6   : > { %s898_s23 = smov (%p25_p0, %s24_s23), 0  ;;  %s900_s24 = smov (!%p25_p0, %s27_s24), %s737_s21 }
   0x7   : > { %p192_p3 = pnand %p555_p1, %p191_p2  ;;  %p29_p4 = scmp.ge.s32.totalorder %s900_s24, 2 }
   0x8   : > { %s215_s25 = smul.u32 (!%p192_p3), %s725_s18, %s729_s19  ;;  %s558_s26 = sshll.u32 (!%p192_p3), %s725_s18, 5 }
   0x9   : > { %s902_s24 = smov (%p29_p4, %s900_s24), 0  ;;  %195 = sbr.rel (%p192_p3) target bundleno = 741 (0x2e5), region = 40 }
   0xa   : > { %s806_s27 = sshra.s32 (!%p192_p3), %s558_s26, 3  ;;  %s556_s28 = sshll.u32 (!%p192_p3), %s215_s25, 2 }
   0xb   : > { %s559_s29 = sshll.u32 (!%p192_p3), %s806_s27, 2  ;;  %p217_p5 = scmp.lt.s32.totalorder (!%p192_p3), %s556_s28, 7 }
   0xc   : > { %s228_s7 = scalar_lea.vmem (!%p192_p3), %s887_s0, %s559_s29  ;;  %p560_p6 = scmp.ne.s32.totalorder (!%p192_p3), %s729_s19, 0 }
   0xe   : > { %v814_v0 = vld [vmem:[%s228_s7] sm:$0xf]  ;;  %v816_v2 = vld [vmem:[%s228_s7] sm:$0xf0]  ;;  %s904_s28 = smov (!%p217_p5, %s556_s28), 7  ;;  %236 = sbr.rel (%p560_p6) target bundleno = 324 (0x144), region = 44 }
   0xf   : > { %v563_v1 = vld [vmem:[%s228_s7] sm:$0xf]  ;;  %v624_v3 = vld [vmem:[%s228_s7] sm:$0xf0]  ;;  %v818_v4 = vld [vmem:[%s228_s7 + $0x8] sm:$0xf] }
  0x10   : > { %v567_v5 = vld [vmem:[%s228_s7 + $0x8] sm:$0xf]  ;;  %v820_v6 = vld [vmem:[%s228_s7 + $0x8] sm:$0xf0]  ;;  %s557_s8 = sshll.u32 %s904_s28, 3 }
  0x11   : > { %v626_v7 = vld [vmem:[%s228_s7 + $0x8] sm:$0xf0]  ;;  %s825_s11 = scalar_lea.vmem %s892_s5, %s557_s8  ;;  %s354_s7 = scalar_lea.vmem (!%p560_p6), [#allocation2], %s559_s29 }
  0x13   : > { %v630_v8 = vld [vmem:[%s888_s1 + $0x18] sm:$0xff]  ;;  %v629_v9 = vld [vmem:[%s888_s1 + $0x10] sm:$0xff]  ;;  %v628_v10 = vld [vmem:[%s888_s1 + $0x8] sm:$0xff]  ;;  %v564_v12 = vor.u32 %v624_v3, %v563_v1  ;;  %v568_v13 = vor.u32 %v626_v7, %v567_v5  ;;  %vm283_vm0 = vcmask 523264   ;;  %vm323_vm1 = vcmask 130048  }
  0x14   : > { %294 = vmatpush.bf16.msra.mxu0 %v630_v8  ;;  %636 = vmatpush.bf16.msra.mxu2 %v630_v8  ;;  %v627_v11 = vld [vmem:[%s888_s1] sm:$0xff]  ;;  %vm355_vm2 = vcmask 60416  }
  0x15   : > { %v631_v14 = vld [vmem:[%s890_s3] sm:$0xff] }
  0x16   : > { %337 = vmatpush.bf16.msra.mxu1 %v631_v14  ;;  %640 = vmatpush.bf16.msra.mxu3 %v631_v14  ;;  %v685_v16 = vld [vmem:[%s889_s2] ss:$0 sm:$0xff] }
  0x18   : > { %295 = vmatpush.bf16.msra.mxu0 %v629_v9  ;;  %637 = vmatpush.bf16.msra.mxu2 %v629_v9 }
  0x1c   : > { %296 = vmatpush.bf16.msra.mxu0 %v628_v10  ;;  %638 = vmatpush.bf16.msra.mxu2 %v628_v10 }
  0x20   : > { %297 = vmatpush.bf16.msra.mxu0 %v627_v11  ;;  %639 = vmatpush.bf16.msra.mxu2 %v627_v11 }
  0x23   : > { %585 = vmatmul.msk.bf16.vlgmr.msra.gmra.mxu0 %vm283_vm0, %v564_v12  ;;  %586 = vmatmul.msk.bf16.vlgmr.msra.gmra.mxu2 %vm283_vm0, %v568_v13 }
  0xa0   : > { %v299_v15 = vpop.f32.mrf.mxu0 }
  0xa1   : > { %v300_v17 = vadd.f32 %v685_v16, %v299_v15 }
  0xa3   : > { %v309_v20 = vmax.f32 %v300_v17, 0.0 }
  0xa6   : > { %v304_v18 = vpop.f32.mrf.mxu2 }
  0xa7   : > { %v305_v23 = vadd.f32 %v685_v16, %v304_v18 }
  0xa8   : > { %v301_v19 = vpop.f32.mrf.mxu0 }
  0xa9   : > { %v302_v21 = vadd.f32 %v685_v16, %v301_v19  ;;  %v311_v27 = vmax.f32 %v305_v23, 0.0 }
  0xab   : > { %v310_v22 = vmax.f32 %v302_v21, 0.0 }
  0xad   : > { %v313_v24 = vpack.c.bf16 %v310_v22, %v309_v20 }
  0xae   : > { %v306_v25 = vpop.f32.mrf.mxu2 }
  0xaf   : > { %v307_v26 = vadd.f32 %v685_v16, %v306_v25  ;;  %591 = vmatmul.msk.bf16.vlgmr.msra.gmra.mxu1 %vm323_vm1, %v313_v24 }
  0xb1   : > { %v312_v28 = vmax.f32 %v307_v26, 0.0 }
  0xb3   : > { %v314_v29 = vpack.c.bf16 %v312_v28, %v311_v27 }
  0xb5   : > { %592 = vmatmul.msk.bf16.vlgmr.msra.gmra.mxu3 %vm323_vm1, %v314_v29 }
 0x12c   : > { %v339_v30 = vpop.f32.mrf.mxu1 }
 0x12d   : > { %v349_v31 = vpack.c.bf16 %v339_v30, %v339_v30 }
 0x12f   : > { %356 = vst.msk [vmem:[%s354_s7] sm:$0xf] %vm355_vm2, %v349_v31 }
 0x134   : > { %v341_v32 = vpop.f32.mrf.mxu1 }
 0x135   : > { %v350_v33 = vpack.c.bf16 %v341_v32, %v341_v32 }
 0x137   : > { %357 = vst.msk [vmem:[%s354_s7 + $0x4] sm:$0xf] %vm355_vm2, %v350_v33 }
 0x138   : > { %v344_v34 = vpop.f32.mrf.mxu3 }
 0x139   : > { %v351_v35 = vpack.c.bf16 %v344_v34, %v344_v34 }
 0x13b   : > { %358 = vst.msk [vmem:[%s354_s7 + $0x8] sm:$0xf] %vm355_vm2, %v351_v35 }
 0x140   : > { %v346_v36 = vpop.f32.mrf.mxu3 }
 0x141   : > { %v352_v37 = vpack.c.bf16 %v346_v36, %v346_v36 }
 0x143   : > { %359 = vst.msk [vmem:[%s354_s7 + $0xc] sm:$0xf] %vm355_vm2, %v352_v37 }
 0x144 PF: > { %p594_p7 = scmp.ne.s32.totalorder %s729_s19, 1 }
 0x146   : > { %363 = sbr.rel (%p594_p7) target bundleno = 741 (0x2e5), region = 48 }
 0x14b   : > { %v635_v38 = vld [vmem:[#allocation2 + $0x18] sm:$0xff]  ;;  %v634_v39 = vld [vmem:[#allocation2 + $0x10] sm:$0xff]  ;;  %v633_v40 = vld [vmem:[#allocation2 + $0x8] sm:$0xff]  ;;  %v598_v42 = vor.u32 %v816_v2, %v814_v0  ;;  %v602_v43 = vor.u32 %v820_v6, %v818_v4  ;;  %vm410_vm3 = vcmask 523264   ;;  %vm436_vm4 = vcmask 64512  }
 0x14c   : > { %421 = vmatpush.bf16.msra.mxu0 %v635_v38  ;;  %641 = vmatpush.bf16.msra.mxu1 %v635_v38  ;;  %v632_v41 = vld [vmem:[#allocation2] sm:$0xff] }
 0x14d   : > { %v686_v44 = vld [vmem:[%s891_s4] ss:$0 sm:$0xff] }
 0x150   : > { %422 = vmatpush.bf16.msra.mxu0 %v634_v39  ;;  %642 = vmatpush.bf16.msra.mxu1 %v634_v39 }
 0x154   : > { %423 = vmatpush.bf16.msra.mxu0 %v633_v40  ;;  %643 = vmatpush.bf16.msra.mxu1 %v633_v40 }
 0x158   : > { %424 = vmatpush.bf16.msra.mxu0 %v632_v41  ;;  %644 = vmatpush.bf16.msra.mxu1 %v632_v41 }
 0x15b   : > { %619 = vmatmul.msk.bf16.vlgmr.msra.gmra.mxu0 %vm410_vm3, %v598_v42  ;;  %620 = vmatmul.msk.bf16.vlgmr.msra.gmra.mxu1 %vm410_vm3, %v602_v43 }
 0x1d8   : > { %v426_v45 = vpop.f32.mrf.mxu0  ;;  %v431_v46 = vpop.f32.mrf.mxu1 }
 0x1d9   : > { %v427_v47 = vadd.f32 %v686_v44, %v426_v45  ;;  %v432_v48 = vadd.f32 %v686_v44, %v431_v46 }
 0x1db   : > { %v443_v49 = vsel %vm436_vm4, %v432_v48, -inf  ;;  %v437_v50 = vsel %vm436_vm4, %v427_v47, -inf }
 0x1dc   : > { %444 = vmax.xlane.f32.xlu1 %v443_v49  ;;  %438 = vmax.xlane.f32.xlu0 %v437_v50 }
 0x1e0   : > { %v428_v51 = vpop.f32.mrf.mxu0  ;;  %v433_v52 = vpop.f32.mrf.mxu1 }
 0x1e1   : > { %v429_v53 = vadd.f32 %v686_v44, %v428_v51  ;;  %v434_v54 = vadd.f32 %v686_v44, %v433_v52 }
 0x1e3   : > { %v446_v55 = vsel %vm436_vm4, %v434_v54, -inf  ;;  %v440_v56 = vsel %vm436_vm4, %v429_v53, -inf }
 0x1e4   : > { %447 = vmax.xlane.f32.xlu1 %v446_v55  ;;  %441 = vmax.xlane.f32.xlu0 %v440_v56 }
 0x24f   : > { %v445_v57 = vpop.xlane.xlu1 %444  ;;  %v439_v58 = vpop.xlane.xlu0 %438 }
 0x250   : > { %v451_v59 = vsub.f32 %v432_v48, %v445_v57  ;;  %v449_v60 = vsub.f32 %v427_v47, %v439_v58 }
 0x252   : > { %v457_v61 = vmul.f32 1.442695, %v451_v59  ;;  %v453_v62 = vmul.f32 1.442695, %v449_v60 }
 0x254   : > { %687 = vpow2.f32 %v457_v61 }
 0x255   : > { %689 = vpow2.f32 %v453_v62 }
 0x257   : > { %v448_v63 = vpop.xlane.xlu1 %447  ;;  %v442_v0 = vpop.xlane.xlu0 %441 }
 0x258   : > { %v452_v1 = vsub.f32 %v434_v54, %v448_v63  ;;  %v450_v2 = vsub.f32 %v429_v53, %v442_v0 }
 0x25a   : > { %v688_v3 = vpop.eup %687  ;;  %v459_v4 = vmul.f32 1.442695, %v452_v1  ;;  %v455_v5 = vmul.f32 1.442695, %v450_v2 }
 0x25b   : > { %v690_v6 = vpop.eup %689  ;;  %v467_v7 = vsel %vm436_vm4, %v688_v3, 0.0 }
 0x25c   : > { %691 = vpow2.f32 %v459_v4  ;;  %468 = vadd.xlane.f32.xlu0 %v467_v7  ;;  %v461_v8 = vsel %vm436_vm4, %v690_v6, 0.0 }
 0x25d   : > { %693 = vpow2.f32 %v455_v5  ;;  %462 = vadd.xlane.f32.xlu2 %v461_v8 }
 0x262   : > { %v692_v9 = vpop.eup %691 }
 0x263   : > { %v694_v10 = vpop.eup %693  ;;  %v470_v11 = vsel %vm436_vm4, %v692_v9, 0.0 }
 0x264   : > { %471 = vadd.xlane.f32.xlu1 %v470_v11  ;;  %v464_v12 = vsel %vm436_vm4, %v694_v10, 0.0 }
 0x265   : > { %465 = vadd.xlane.f32.xlu2 %v464_v12 }
 0x2cf   : > { %v469_v14 = vpop.xlane.xlu0 %468 }
 0x2d0   : > { %v463_v13 = vpop.xlane.xlu2 %462 }
 0x2d1   : > { %695 = vlog2.f32 %v463_v13 }
 0x2d2   : > { %697 = vlog2.f32 %v469_v14 }
 0x2d7   : > { %v696_v15 = vpop.eup %695  ;;  %v472_v16 = vpop.xlane.xlu1 %471 }
 0x2d8   : > { %v474_v17 = vmul.f32 0.6931472, %v696_v15  ;;  %699 = vlog2.f32 %v472_v16  ;;  %v466_v18 = vpop.xlane.xlu2 %465  ;;  %v698_v20 = vpop.eup %697 }
 0x2d9   : > { %701 = vlog2.f32 %v466_v18  ;;  %v478_v23 = vmul.f32 0.6931472, %v698_v20 }
 0x2da   : > { %v481_v19 = vsub.f32 %v449_v60, %v474_v17 }
 0x2db   : > { %v483_v27 = vsub.f32 %v451_v59, %v478_v23 }
 0x2dc   : > { %485 = vst.msk [vmem:[%s825_s11] sm:$0xff] %vm436_vm4, %v481_v19 }
 0x2dd   : > { %487 = vst.msk [vmem:[%s825_s11 + $0x10] sm:$0xff] %vm436_vm4, %v483_v27 }
 0x2de   : > { %v700_v21 = vpop.eup %699 }
 0x2df   : > { %v702_v22 = vpop.eup %701  ;;  %v480_v24 = vmul.f32 0.6931472, %v700_v21 }
 0x2e0   : > { %v476_v25 = vmul.f32 0.6931472, %v702_v22 }
 0x2e1   : > { %v484_v28 = vsub.f32 %v452_v1, %v480_v24 }
 0x2e2   : > { %v482_v26 = vsub.f32 %v450_v2, %v476_v25 }
 0x2e3   : > { %488 = vst.msk [vmem:[%s825_s11 + $0x18] sm:$0xff] %vm436_vm4, %v484_v28 }
 0x2e4   : > { %486 = vst.msk [vmem:[%s825_s11 + $0x8] sm:$0xff] %vm436_vm4, %v482_v26 }
 0x2e5 PF: > { %s15_s22 = sadd.s32 1, %s741_s22   ;;  %s893_s18 = smov %s733_s20 }
 0x2e6   : > { %p12_p8 = scmp.ge.s32.totalorder %s15_s22, 6   ;;  %s894_s19 = smov %s737_s21 }
 0x2e7   : > { %s895_s20 = smov %s898_s23  ;;  %s896_s21 = smov %s902_s24 }
 0x2e8   :  { %14 = sbr.rel (!%p12_p8) target bundleno = 3 (0x3), region = 77 }

</bundles_post_ra>
